<compile_context>
chip_gen: v7x
topology: tpu7x:2x2x1
jax: 0.10.0
libtpu: 0.0.40
codegen_flags: <defaults>
</compile_context>

<pallas_src>
import jax
import jax.numpy as jnp
from jax import lax
from jax.experimental import pallas as pl
from jax.experimental.pallas import tpu as pltpu

HIDDEN = 128
_SUBLANE = 8
_LANE = 128


def _round_up(n, m):
    return ((n + m - 1) // m) * m


def mlp_kernel(x_ref, w1_ref, b1_ref, w2_ref, b2_ref, o_ref):
    # First linear on the MXU: (tb, F) @ (F, 128), f32 accumulate.
    h = jnp.dot(x_ref[...], w1_ref[...], preferred_element_type=jnp.float32)
    h = h + b1_ref[...]                       # (tb, 128) + (1, 128) on the VPU
    # sigmoid(x) = 0.5 * (tanh(x/2) + 1): one EUP op, no vector divide.
    h = 0.5 * (jnp.tanh(0.5 * h) + 1.0)
    # Second linear (128 -> 1): contract both operands on their LAST dim
    # (MXU trans_b; no XLU transpose of h).  (1,128).(tb,128)^T -> (1, tb):
    # M=1 so the MXU cost is negligible and the result is born lane-dense.
    r = lax.dot_general(w2_ref[...], h,
                        dimension_numbers=(((1,), (1,)), ((), ())),
                        preferred_element_type=jnp.float32)     # (1, tb)
    r = r + b2_ref[0, 0]                                         # SMEM scalar bias
    # (1, tb) output block: full-lane unmasked stores, 8x less HBM writeback
    # than the old 8-sublane broadcast.
    o_ref[...] = r.astype(o_ref.dtype)


def _choose_tile(B, block_b):
    """Pick (tb, b_pad).

    Single-tile path (small batch): tb == b_pad == round_up(B, 8) — the block
    equals the full array so no 128-lane divisibility is needed.
    Tiled path: tb is a multiple of 128 (output lane block rule) and we keep
    >= 2 tiles so both v7x TensorCores get work under "parallel".
    """
    block_b = max(_LANE, (block_b // _LANE) * _LANE)   # lane-divisibility guard
    if B <= block_b and B <= 2048:
        tb = _round_up(B, _SUBLANE)
        return tb, tb
    tb = min(block_b, _round_up(pl.cdiv(B, 2), _LANE))
    b_pad = _round_up(B, tb)
    return tb, b_pad


def tempture_forward(x, w1, b1, w2, b2, *, block_b=8192):
    """x: (B, F); w1: (F, 128); b1: (1, 128); w2: (128, 1); b2: (1, 1) -> (B, 1).

    x / w1 may be f32 or bf16 (no cast is added here); accumulation is f32.
    block_b: batch-tile sweep knob — ~8192 for v6e/v7x, 2048-4096 on v5e.
    """
    B, F = x.shape
    tb, b_pad = _choose_tile(B, block_b)
    if b_pad != B:
        x = jnp.pad(x, ((0, b_pad - B), (0, 0)))
    num_tiles = b_pad // tb

    w2_row = w2.reshape(1, HIDDEN)            # (128, 1) -> (1, 128)
    b2_s = b2.reshape(1, 1).astype(jnp.float32)

    # x is streamed per batch tile; deepen buffering when the grid is long
    # enough for a third in-flight buffer to matter.
    if num_tiles >= 3:
        x_spec = pl.BlockSpec((tb, F), lambda i: (i, 0),
                              pipeline_mode=pl.Buffered(3))
    else:
        x_spec = pl.BlockSpec((tb, F), lambda i: (i, 0))

    out = pl.pallas_call(
        mlp_kernel,
        out_shape=jax.ShapeDtypeStruct((1, b_pad), jnp.float32),
        grid=(num_tiles,),
        in_specs=[
            x_spec,
            # Weights / biases: constant index map -> VMEM-resident across steps.
            pl.BlockSpec((F, HIDDEN), lambda i: (0, 0)),
            pl.BlockSpec((1, HIDDEN), lambda i: (0, 0)),
            pl.BlockSpec((1, HIDDEN), lambda i: (0, 0)),
            # b2: scalar in SMEM.
            pl.BlockSpec(memory_space=pltpu.MemorySpace.SMEM),
        ],
        # Lane-dense (1, b_pad) output: batch lives on the lane axis.
        out_specs=pl.BlockSpec((1, tb), lambda i: (0, i)),
        compiler_params=pltpu.CompilerParams(
            dimension_semantics=("parallel",),   # shard batch tiles across TCs (v7x)
        ),
    )(x, w1, b1, w2_row, b2_s)

    return out[0, :B].reshape(B, 1)


def init_params(key, input_size):
    """PyTorch-Linear-equivalent shapes, stored transposed for x @ W layout."""
    k1, k2, k3, k4 = jax.random.split(key, 4)
    bound1 = 1.0 / (input_size ** 0.5)
    w1 = jax.random.uniform(k1, (input_size, HIDDEN), jnp.float32, -bound1, bound1)
    b1 = jax.random.uniform(k2, (1, HIDDEN), jnp.float32, -bound1, bound1)
    bound2 = 1.0 / (HIDDEN ** 0.5)
    w2 = jax.random.uniform(k3, (HIDDEN, 1), jnp.float32, -bound2, bound2)
    b2 = jax.random.uniform(k4, (1, 1), jnp.float32, -bound2, bound2)
    return w1, b1, w2, b2


if __name__ == "__main__":
    key = jax.random.PRNGKey(0)
    kx, kp, kx2, kx3 = jax.random.split(key, 4)

    input_size = 32
    w1, b1, w2, b2 = init_params(kp, input_size)

    def ref_fn(xx):
        return jax.nn.sigmoid(xx @ w1 + b1) @ w2 + b2

    # Small shape (single full-array tile, no 128-lane requirement).
    x_small = jax.random.normal(kx, (8, input_size), jnp.float32)
    out_small = jax.block_until_ready(tempture_forward(x_small, w1, b1, w2, b2))
    assert out_small.shape == (8, 1)
    assert jnp.allclose(out_small, ref_fn(x_small), atol=1e-4, rtol=1e-4)

    # Mid-size, non-multiple-of-8x128 batch: still a single full-array tile.
    x_mid = jax.random.normal(kx2, (1000, input_size), jnp.float32)
    out_mid = jax.block_until_ready(tempture_forward(x_mid, w1, b1, w2, b2))
    assert out_mid.shape == (1000, 1)
    assert jnp.allclose(out_mid, ref_fn(x_mid), atol=1e-4, rtol=1e-4)

    # Larger batch with a small block_b: exercises the multi-tile grid,
    # batch padding, 128-aligned lane blocks and the Buffered(3) x pipeline.
    x_big = jax.random.normal(kx3, (3000, input_size), jnp.float32)
    out_big = jax.block_until_ready(
        tempture_forward(x_big, w1, b1, w2, b2, block_b=1024))
    assert out_big.shape == (3000, 1)
    assert jnp.allclose(out_big, ref_fn(x_big), atol=1e-4, rtol=1e-4)

    print("KERNEL_OK")
</pallas_src>

<mosaic_0001>
module attributes {stable_mosaic.version = 11 : i64} {
  func.func @mlp_kernel(%arg0: i32, %arg1: memref<8x32xf32, #tpu.memory_space<vmem>>, %arg2: memref<32x128xf32, #tpu.memory_space<vmem>>, %arg3: memref<1x128xf32, #tpu.memory_space<vmem>>, %arg4: memref<1x128xf32, #tpu.memory_space<vmem>>, %arg5: memref<1x1xf32, #tpu.memory_space<smem>>, %arg6: memref<1x8xf32, #tpu.memory_space<vmem>>) attributes {dimension_semantics = [#tpu.dimension_semantics<parallel>], iteration_bounds = array<i64: 1>, scalar_prefetch = 0 : i64, scratch_operands = 0 : i64, tpu.core_type = #tpu.core_type<tc>, window_params = [{transform_indices = @transform_0, window_bounds = array<i64: 8, 32>}, {pipeline_mode = #tpu.pipeline_mode<synchronous>, transform_indices = @transform_1, window_bounds = array<i64: 32, 128>}, {pipeline_mode = #tpu.pipeline_mode<synchronous>, transform_indices = @transform_2, window_bounds = array<i64: 1, 128>}, {pipeline_mode = #tpu.pipeline_mode<synchronous>, transform_indices = @transform_3, window_bounds = array<i64: 1, 128>}, {transform_indices = @transform_4, window_bounds = array<i64: 1, 1>}, {transform_indices = @transform_5, window_bounds = array<i64: 1, 8>}]} {
    %c0 = arith.constant 0 : index
    %c0_0 = arith.constant 0 : index
    %0 = vector.load %arg1[%c0, %c0_0] : memref<8x32xf32, #tpu.memory_space<vmem>>, vector<8x32xf32>
    %c0_1 = arith.constant 0 : index
    %c0_2 = arith.constant 0 : index
    %1 = vector.load %arg2[%c0_1, %c0_2] : memref<32x128xf32, #tpu.memory_space<vmem>>, vector<32x128xf32>
    %cst = arith.constant dense<0.000000e+00> : vector<8x128xf32>
    %2 = tpu.matmul %0, %1, %cst {dimension_numbers = #tpu.dot_dimension_numbers<[1], [0], [0], [1], [0, 0, 1, 1], [], []>} : vector<8x32xf32>, vector<32x128xf32>, vector<8x128xf32> -> vector<8x128xf32>
    %c0_3 = arith.constant 0 : index
    %c0_4 = arith.constant 0 : index
    %3 = vector.load %arg3[%c0_3, %c0_4] : memref<1x128xf32, #tpu.memory_space<vmem>>, vector<1x128xf32>
    %4 = vector.broadcast %3 : vector<1x128xf32> to vector<8x128xf32>
    %5 = arith.addf %2, %4 : vector<8x128xf32>
    %cst_5 = arith.constant 5.000000e-01 : f32
    %6 = vector.broadcast %cst_5 : f32 to vector<8x128xf32>
    %7 = arith.mulf %6, %5 : vector<8x128xf32>
    %8 = math.tanh %7 : vector<8x128xf32>
    %cst_6 = arith.constant 1.000000e+00 : f32
    %9 = vector.broadcast %cst_6 : f32 to vector<8x128xf32>
    %10 = arith.addf %8, %9 : vector<8x128xf32>
    %cst_7 = arith.constant 5.000000e-01 : f32
    %11 = vector.broadcast %cst_7 : f32 to vector<8x128xf32>
    %12 = arith.mulf %11, %10 : vector<8x128xf32>
    %c0_8 = arith.constant 0 : index
    %c0_9 = arith.constant 0 : index
    %13 = vector.load %arg4[%c0_8, %c0_9] : memref<1x128xf32, #tpu.memory_space<vmem>>, vector<1x128xf32>
    %cst_10 = arith.constant dense<0.000000e+00> : vector<1x8xf32>
    %14 = tpu.matmul %13, %12, %cst_10 {dimension_numbers = #tpu.dot_dimension_numbers<[1], [1], [0], [0], [0, 0, 1, 0], [], []>} : vector<1x128xf32>, vector<8x128xf32>, vector<1x8xf32> -> vector<1x8xf32>
    %c0_11 = arith.constant 0 : index
    %c0_12 = arith.constant 0 : index
    %15 = memref.load %arg5[%c0_11, %c0_12] : memref<1x1xf32, #tpu.memory_space<smem>>
    %16 = vector.broadcast %15 : f32 to vector<1x8xf32>
    %17 = arith.addf %14, %16 : vector<1x8xf32>
    %c0_13 = arith.constant 0 : index
    %c0_14 = arith.constant 0 : index
    %18 = vector.load %arg6[%c0_13, %c0_14] : memref<1x8xf32, #tpu.memory_space<vmem>>, vector<1x8xf32>
    tpu.vector_store %arg6[%c0_13, %c0_14], %17 {strides = array<i32>} : memref<1x8xf32, #tpu.memory_space<vmem>>, vector<1x8xf32>,
    return
  }
  func.func @transform_0(%arg0: i32) -> (i32, i32) {
    %c0_i32 = arith.constant 0 : i32
    %c0_i32_0 = arith.constant 0 : i32
    return %arg0, %c0_i32 : i32, i32
  }
  func.func @transform_1(%arg0: i32) -> (i32, i32) {
    %c0_i32 = arith.constant 0 : i32
    %c0_i32_0 = arith.constant 0 : i32
    %c0_i32_1 = arith.constant 0 : i32
    return %c0_i32, %c0_i32_0 : i32, i32
  }
  func.func @transform_2(%arg0: i32) -> (i32, i32) {
    %c0_i32 = arith.constant 0 : i32
    %c0_i32_0 = arith.constant 0 : i32
    %c0_i32_1 = arith.constant 0 : i32
    return %c0_i32, %c0_i32_0 : i32, i32
  }
  func.func @transform_3(%arg0: i32) -> (i32, i32) {
    %c0_i32 = arith.constant 0 : i32
    %c0_i32_0 = arith.constant 0 : i32
    %c0_i32_1 = arith.constant 0 : i32
    return %c0_i32, %c0_i32_0 : i32, i32
  }
  func.func @transform_4(%arg0: i32) -> (i32, i32) {
    %c0_i32 = arith.constant 0 : i32
    %c0_i32_0 = arith.constant 0 : i32
    %c0_i32_1 = arith.constant 0 : i32
    return %c0_i32, %c0_i32_0 : i32, i32
  }
  func.func @transform_5(%arg0: i32) -> (i32, i32) {
    %c0_i32 = arith.constant 0 : i32
    %c0_i32_0 = arith.constant 0 : i32
    return %c0_i32, %arg0 : i32, i32
  }
}

</mosaic_0001>

<bundles_post_ra>
// kernel: tpu_custom_call.1
= control target key start
LH: loop header
LB: loop body
LE: loop exit
PB: predicated region body
PF: predicated region fallthrough
CT: control target
= control target key end

     0   :  { %11 = vsyncpa [#allocation4], 0  ;;  %s432_s0 = inlined_call_operand.hbm [shape: f32[8,32], index: 0, kind: input, shape index: {}]   ;;  %s433_s1 = inlined_call_operand.hbm [shape: f32[32,128], index: 1, kind: input, shape index: {}]   ;;  %s434_s2 = inlined_call_operand.vmem [shape: f32[1,128], index: 2, kind: input, shape index: {}]   ;;  %s435_s3 = inlined_call_operand.vmem [shape: f32[1,128], index: 3, kind: input, shape index: {}]   ;;  %s436_s4 = inlined_call_operand.<no memory space> [shape: f32[1,1], index: 4, kind: input, shape index: {}]   ;;  %s437_s5 = inlined_call_operand.hbm [shape: f32[1,8], index: 5, kind: output, shape index: {}]  }
   0x1   :  { %12 = vsyncpa [#allocation7], 0 }
   0x2   :  { %13 = vsyncpa [#allocation5], 0  ;;  %s342_s18 = smov [#allocation3]   ;;  %s343_s20 = smov [#allocation6]  }
   0x3   :  { %s20_s19 = sshll.u32 %s342_s18, 4  ;;  %s29_s21 = sshll.u32 %s343_s20, 4  ;;  %s21_s19 = int_to_ptr.vmem [resolvable:$true] %s20_s19  ;;  %s380_s21 = int_to_ptr.vmem [resolvable:$true] %s29_s21 }
   0x4   :  { %s270_s24 = scalar_lea.hbm %s432_s0, 128 }
   0x5   :  { %p271_p0 = scmp.ne.s32.totalorder %s432_s0, %s270_s24  ;;  %p274_p1 = scmp.lt.u32.totalorder %s270_s24, %s432_s0 }
   0x7   :  { %p276_p2 = pnand %p274_p1, %p271_p0 }
   0x9   :  { %279 = shalt.err (!%p276_p2)
}
   0xa   :  { %s280_s29 = scalar_lea.vmem %s21_s19, 128  ;;  %p285_p4 = scmp.lt.s32.totalorder %s21_s19, %s21_s19 }
   0xb   :  { %p281_p3 = scmp.ne.s32.totalorder %s21_s19, %s280_s29  ;;  %p286_p5 = scmp.lt.s32.totalorder %s280_s29, %s280_s29 }
   0xd   :  { %p287_p6 = por %p286_p5, %p285_p4 }
   0xf   :  { %p288_p7 = pnand %p287_p6, %p281_p3 }
  0x11   :  { %291 = shalt.err (!%p288_p7)
}
  0x12   :  { %23 = dma.hbm_to_vmem [thread:$0]  %s432_s0, 128, %s21_s19, [#allocation4]  }
  0x13   :  { %s292_s9 = scalar_lea.hbm %s433_s1, 512 }
  0x14   :  { %p293_p8 = scmp.ne.s32.totalorder %s433_s1, %s292_s9  ;;  %p296_p9 = scmp.lt.u32.totalorder %s292_s9, %s433_s1 }
  0x16   :  { %p298_p10 = pnand %p296_p9, %p293_p8 }
  0x18   :  { %301 = shalt.err (!%p298_p10)
}
  0x19   :  { %s302_s14 = scalar_lea.vmem %s380_s21, 512  ;;  %p307_p12 = scmp.lt.s32.totalorder %s380_s21, %s380_s21 }
  0x1a   :  { %p303_p11 = scmp.ne.s32.totalorder %s380_s21, %s302_s14  ;;  %p308_p13 = scmp.lt.s32.totalorder %s302_s14, %s302_s14 }
  0x1c   :  { %p309_p0 = por %p308_p13, %p307_p12 }
  0x1e   :  { %p310_p1 = pnand %p309_p0, %p303_p11 }
  0x20   :  { %313 = shalt.err (!%p310_p1)
}
  0x21   :  { %s344_s0 = smov 128   ;;  %s345_s15 = smov 8  }
  0x22   :  { %35 = dma.hbm_to_vmem [thread:$0]  %s433_s1, 512, %s380_s21, [#allocation7], %s344_s0, %s344_s0, %s345_s15  }
  0x23   :  { %336 = dma.done.wait [#allocation4], 128  }
  0x24   :  { %337 = vsyncadd [#allocation4], 4294967168 }
  0x25   :  { %338 = dma.done.wait [#allocation7], 512  }
  0x26   :  { %339 = vsyncadd [#allocation7], 4294966784  ;;  %v346_v0 = vmov 0.0|0.0   ;;  %vm347_vm0 = vmmov 0   ;;  %v348_v1 = vmov 0.0   ;;  %v49_v2 = vld [vmem:[#allocation6] sm:$0xff]  ;;  %v140_v18 = vstv %s436_s4 }
  0x27   :  { %254 = vmatprep.subr.bf16.mxu0 %v346_v0  ;;  %246 = vmatprep.mubr.msk.f32.mxu0 %vm347_vm0, %v348_v1  ;;  %v50_v3 = vld [vmem:[#allocation6 + $0x8] sm:$0xff]  ;;  %v51_v4 = vld [vmem:[#allocation6 + $0x10] sm:$0xff]  ;;  %v52_v6 = vld [vmem:[#allocation6 + $0x18] sm:$0xff]  ;;  %vm60_vm1 = vcmask 261120   ;;  %s349_s23 = smov [#allocation8]   ;;  %vm211_vm2 = vcmask 57344  }
  0x28   :  { %249 = vmatprep.subr.mxu1 %v348_v1  ;;  %251 = vmatprep.mubr.msk.f32.mxu1 %vm347_vm0, %v348_v1  ;;  %v255_v5 = vpack.c.bf16 %v50_v3, %v49_v2  ;;  %v258_v7 = vpack.c.bf16 %v52_v6, %v51_v4  ;;  %v48_v8 = vld [vmem:[#allocation3] sm:$0xff] }
  0x29   :  { %v229_v9 = vld [vmem:[%s434_s2] ss:$0 sm:$0xff]  ;;  %s219_s2 = sshll.u32 %s349_s23, 4  ;;  %s220_s2 = int_to_ptr.vmem [resolvable:$true] %s219_s2 }
  0x2a   :  { %256 = vmatpush3.bf16.msra.mxu0 %v255_v5  ;;  %v138_v17 = vld [vmem:[%s435_s3] sm:$0x1]  ;;  %s314_s24 = scalar_lea.vmem %s220_s2, 16  ;;  %s318_s25 = scalar_lea.vmem %s220_s2, 32 }
  0x2b   :  { %257 = vmatprep.subr.bf16.mxu0 %v346_v0  ;;  %p315_p2 = scmp.ne.s32.totalorder %s220_s2, %s314_s24  ;;  %p319_p3 = scmp.lt.s32.totalorder %s220_s2, %s220_s2 }
  0x2c   :  { %p320_p4 = scmp.lt.s32.totalorder %s318_s25, %s314_s24 }
  0x2e   :  { %259 = vmatpush3.bf16.msra.mxu0 %v258_v7  ;;  %p321_p5 = por %p320_p4, %p319_p3 }
  0x30   :  { %p322_p6 = pnand %p321_p5, %p315_p2 }
  0x31   :  { %247 = vmatmul.mubr.msk.f32.vlgmr.msra.gmra.mrb[0].mxu0 %vm60_vm1, %v48_v8 }
 0x104   :  { %v130_v10 = vpop.f32.mrb[0].mxu0 }
 0x105   :  { %v131_v11 = vadd.f32 %v229_v9, %v130_v10  ;;  %v248_v12 = vpop.f32.mrb[1].mxu0 }
 0x107   :  { %v134_v13 = vmul.f32 0.5, %v131_v11 }
 0x109   :  { %268 = vtanh.f32 %v134_v13 }
 0x113   :  { %v269_v14 = vpop.eup %268 }
 0x114   :  { %v136_v15 = vadd.f32 1.0, %v269_v14 }
 0x116   :  { %v137_v16 = vmul.f32 0.5, %v136_v15 }
 0x118   :  { %250 = vmatpush3.xpose.msra.mxu1 %v137_v16 }
 0x11b   :  { %252 = vmatmul.mubr.f32.vlgmr.msra.gmra.mrb[0].mxu1 %v138_v17 }
 0x1ee   :  { %v207_v19 = vpop.f32.mrb[0].mxu1 }
 0x1ef   :  { %v208_v20 = vadd.f32 %v207_v19, %v140_v18  ;;  %v253_v21 = vpop.f32.mrb[1].mxu1 }
 0x1f1   :  { %212 = vst.msk [vmem:[#allocation8] sm:$0x1] %vm211_vm2, %v208_v20 }
 0x1f2   :  { %325 = shalt.err (!%p322_p6)
}
 0x1f3   :  { %s326_s4 = scalar_lea.hbm %s437_s5, 16 }
 0x1f4   :  { %p327_p7 = scmp.ne.s32.totalorder %s437_s5, %s326_s4  ;;  %p330_p8 = scmp.lt.u32.totalorder %s326_s4, %s437_s5 }
 0x1f6   :  { %p332_p9 = pnand %p330_p8, %p327_p7 }
 0x1f8   :  { %335 = shalt.err (!%p332_p9)
}
 0x1f9   :  { %222 = dma.vmem_to_hbm [thread:$0]  %s220_s2, 16, %s437_s5, [#allocation5]  }
 0x1fa   :  { %340 = dma.done.wait [#allocation5], 16  }
 0x1fb   :  { %341 = vsyncadd [#allocation5], 4294967280 }
 0x1fc   :  { %226 = vsyncpa [#allocation4], 1 }
 0x1fd   :  { %227 = vsyncpa [#allocation7], 1 }
 0x1fe   :  { %228 = vsyncpa [#allocation5], 1 }

</bundles_post_ra>
